<compile_context>
chip_gen: v5e
topology: v5e:2x2
jax: 0.10.0
libtpu: 0.0.40
codegen_flags: <defaults>
</compile_context>

<pallas_src>
import functools

import jax
import jax.numpy as jnp
from jax.experimental import pallas as pl
from jax.experimental.pallas import tpu as pltpu

LANE = 128


def _round_up(x, m):
    return ((x + m - 1) // m) * m


def _walker_kernel(x_ref, w1_ref, b1_ref, w2_ref, b2_ref, w3_ref, b3_ref,
                   out_ref, *, max_action):
    # Layer 1: Linear (bf16 MXU, f32 acc) + bias + ReLU in f32
    h1 = jnp.dot(x_ref[...], w1_ref[...],
                 preferred_element_type=jnp.float32) + b1_ref[...]
    h1 = jnp.maximum(h1, 0.0)

    # Layer 2
    h2 = jnp.dot(h1.astype(jnp.bfloat16), w2_ref[...],
                 preferred_element_type=jnp.float32) + b2_ref[...]
    h2 = jnp.maximum(h2, 0.0)

    # Output layer: Linear + tanh, scaled by max_action (f32 elementwise)
    h3 = jnp.dot(h2.astype(jnp.bfloat16), w3_ref[...],
                 preferred_element_type=jnp.float32) + b3_ref[...]
    out_ref[...] = (max_action * jnp.tanh(h3)).astype(out_ref.dtype)


def init_params(key, state_dim, action_dim, neurons_list=(128, 128)):
    """Deterministic Xavier-uniform weights + uniform(-1/sqrt(fan_in)) biases (f32)."""
    h1, h2 = neurons_list
    dims = [(state_dim, h1), (h1, h2), (h2, action_dim)]
    params = {}
    keys = jax.random.split(key, 2 * len(dims))
    for i, (fan_in, fan_out) in enumerate(dims):
        wk, bk = keys[2 * i], keys[2 * i + 1]
        bound_w = (6.0 / (fan_in + fan_out)) ** 0.5       # xavier_uniform
        bound_b = 1.0 / (fan_in ** 0.5)                   # torch Linear bias default
        params[f"w{i+1}"] = jax.random.uniform(
            wk, (fan_in, fan_out), jnp.float32, -bound_w, bound_w)
        params[f"b{i+1}"] = jax.random.uniform(
            bk, (1, fan_out), jnp.float32, -bound_b, bound_b)
    return params


def prepare_params(params):
    """One-time: zero-pad every dim to a multiple of 128 lanes, cast weights to bf16.

    Zero padding is exact: padded input columns hit zero weight rows, padded hidden
    lanes get zero bias -> relu(0)=0 -> multiply zero rows of the next weight, and
    padded output lanes produce tanh(0)=0 which the wrapper slices away.
    """
    prepped = {}
    for i in (1, 2, 3):
        w = params[f"w{i}"]
        b = params[f"b{i}"]
        kin, kout = w.shape
        kin_p, kout_p = _round_up(kin, LANE), _round_up(kout, LANE)
        prepped[f"w{i}"] = jnp.pad(
            w, ((0, kin_p - kin), (0, kout_p - kout))).astype(jnp.bfloat16)
        prepped[f"b{i}"] = jnp.pad(
            b, ((0, 0), (0, kout_p - kout))).astype(jnp.float32)
    return prepped


def walker_net_forward(state, prepped, action_dim, max_action=1.0, block_b=512):
    """state: f32[B, state_dim]; prepped: output of prepare_params(); returns f32[B, action_dim]."""
    B, state_dim = state.shape
    Kp, H1 = prepped["w1"].shape
    _, H2 = prepped["w2"].shape
    _, Np = prepped["w3"].shape

    # Batch tile: large (up to block_b) and a multiple of 256 (fills 256x256 MXU on
    # v6e/v7x; 128-row granularity already saturates v5e). Tiny batches pad to one tile.
    TB = min(block_b, _round_up(B, 256))
    Bp = _round_up(B, TB)
    grid = (pl.cdiv(Bp, TB),)

    # Pad batch + state lanes, cast activations to bf16 (halves HBM->VMEM bytes).
    xp = jnp.pad(state.astype(jnp.bfloat16),
                 ((0, Bp - B), (0, Kp - state_dim)))

    w1, b1 = prepped["w1"], prepped["b1"]
    w2, b2 = prepped["w2"], prepped["b2"]
    w3, b3 = prepped["w3"], prepped["b3"]

    const = lambda i: (0, 0)          # weights/biases stay resident across batch tiles
    tiled = lambda i: (i, 0)          # batch-tiled activations / output

    flops = 2 * Bp * (Kp * H1 + H1 * H2 + H2 * Np)
    bytes_accessed = (xp.size * 2
                      + sum(a.size * a.dtype.itemsize
                            for a in (w1, b1, w2, b2, w3, b3))
                      + Bp * Np * 4)
    cost = pl.CostEstimate(flops=flops,
                           transcendentals=Bp * Np,          # tanh
                           bytes_accessed=bytes_accessed)

    kernel = functools.partial(_walker_kernel, max_action=float(max_action))

    out_padded = pl.pallas_call(
        kernel,
        out_shape=jax.ShapeDtypeStruct((Bp, Np), jnp.float32),
        grid=grid,
        in_specs=[
            pl.BlockSpec((TB, Kp), tiled),     # x
            pl.BlockSpec((Kp, H1), const),     # w1
            pl.BlockSpec((1, H1), const),      # b1
            pl.BlockSpec((H1, H2), const),     # w2
            pl.BlockSpec((1, H2), const),      # b2
            pl.BlockSpec((H2, Np), const),     # w3
            pl.BlockSpec((1, Np), const),      # b3
        ],
        out_specs=pl.BlockSpec((TB, Np), tiled),
        compiler_params=pltpu.CompilerParams(
            dimension_semantics=("parallel",)),   # megacore split on v7x; no-op on v5e/v6e
        cost_estimate=cost,
    )(xp, w1, b1, w2, b2, w3, b3)

    return out_padded[:B, :action_dim]


def walker_net_ref(state, params, max_action=1.0):
    """Pure-JAX f32 reference (matches the PyTorch module's math)."""
    a = jnp.maximum(state @ params["w1"] + params["b1"], 0.0)
    a = jnp.maximum(a @ params["w2"] + params["b2"], 0.0)
    return max_action * jnp.tanh(a @ params["w3"] + params["b3"])


def walker_net_ref_bf16(state, params, max_action=1.0):
    """Reference with the same bf16-matmul / f32-accumulate quantization as the kernel."""
    bf = jnp.bfloat16
    h1 = jnp.dot(state.astype(bf), params["w1"].astype(bf),
                 preferred_element_type=jnp.float32) + params["b1"]
    h1 = jnp.maximum(h1, 0.0)
    h2 = jnp.dot(h1.astype(bf), params["w2"].astype(bf),
                 preferred_element_type=jnp.float32) + params["b2"]
    h2 = jnp.maximum(h2, 0.0)
    h3 = jnp.dot(h2.astype(bf), params["w3"].astype(bf),
                 preferred_element_type=jnp.float32) + params["b3"]
    return max_action * jnp.tanh(h3)


if __name__ == "__main__":
    # Walker2d-like shapes: state_dim=17, hidden=[128,128], action_dim=6
    key = jax.random.PRNGKey(0)
    pkey, xkey, xkey2 = jax.random.split(key, 3)

    state_dim, action_dim, max_action = 17, 6, 1.0
    params = init_params(pkey, state_dim, action_dim, neurons_list=(128, 128))
    prepped = prepare_params(params)   # pad + bf16-cast once, reuse across calls

    # Small batch (single padded tile)
    state = jax.random.normal(xkey, (8, state_dim), dtype=jnp.float32)
    out = walker_net_forward(state, prepped, action_dim, max_action=max_action)
    out = jax.block_until_ready(out)
    assert out.shape == (8, action_dim)
    assert jnp.allclose(out, walker_net_ref_bf16(state, params, max_action),
                        atol=1e-3, rtol=1e-3), "mismatch vs bf16 reference"
    assert jnp.allclose(out, walker_net_ref(state, params, max_action),
                        atol=3e-2, rtol=0.0), "mismatch vs f32 reference"

    # Larger batch exercising the multi-tile batch grid (TB=512, 2 grid steps)
    state2 = jax.random.normal(xkey2, (600, state_dim), dtype=jnp.float32)
    out2 = jax.block_until_ready(
        walker_net_forward(state2, prepped, action_dim, max_action=max_action))
    assert out2.shape == (600, action_dim)
    assert jnp.allclose(out2, walker_net_ref_bf16(state2, params, max_action),
                        atol=1e-3, rtol=1e-3), "mismatch vs bf16 reference (batched)"

    # TODO(synk): normalise=True (LayerNorm) / affine=True branches of WalkerNet are
    # not exercised by the default config and are not implemented here.
    print("KERNEL_OK")
</pallas_src>

<mosaic_0001>
module attributes {stable_mosaic.version = 11 : i64} {
  func.func @_walker_kernel(%arg0: i32, %arg1: memref<256x128xbf16, #tpu.memory_space<vmem>>, %arg2: memref<128x128xbf16, #tpu.memory_space<vmem>>, %arg3: memref<1x128xf32, #tpu.memory_space<vmem>>, %arg4: memref<128x128xbf16, #tpu.memory_space<vmem>>, %arg5: memref<1x128xf32, #tpu.memory_space<vmem>>, %arg6: memref<128x128xbf16, #tpu.memory_space<vmem>>, %arg7: memref<1x128xf32, #tpu.memory_space<vmem>>, %arg8: memref<256x128xf32, #tpu.memory_space<vmem>>) attributes {dimension_semantics = [#tpu.dimension_semantics<parallel>], iteration_bounds = array<i64: 1>, scalar_prefetch = 0 : i64, scratch_operands = 0 : i64, tpu.core_type = #tpu.core_type<tc>, window_params = [{transform_indices = @transform_0, window_bounds = array<i64: 256, 128>}, {pipeline_mode = #tpu.pipeline_mode<synchronous>, transform_indices = @transform_1, window_bounds = array<i64: 128, 128>}, {pipeline_mode = #tpu.pipeline_mode<synchronous>, transform_indices = @transform_2, window_bounds = array<i64: 1, 128>}, {pipeline_mode = #tpu.pipeline_mode<synchronous>, transform_indices = @transform_3, window_bounds = array<i64: 128, 128>}, {pipeline_mode = #tpu.pipeline_mode<synchronous>, transform_indices = @transform_4, window_bounds = array<i64: 1, 128>}, {pipeline_mode = #tpu.pipeline_mode<synchronous>, transform_indices = @transform_5, window_bounds = array<i64: 128, 128>}, {pipeline_mode = #tpu.pipeline_mode<synchronous>, transform_indices = @transform_6, window_bounds = array<i64: 1, 128>}, {transform_indices = @transform_7, window_bounds = array<i64: 256, 128>}]} {
    %c0 = arith.constant 0 : index
    %c0_0 = arith.constant 0 : index
    %0 = vector.load %arg1[%c0, %c0_0] : memref<256x128xbf16, #tpu.memory_space<vmem>>, vector<256x128xbf16>
    %c0_1 = arith.constant 0 : index
    %c0_2 = arith.constant 0 : index
    %1 = vector.load %arg2[%c0_1, %c0_2] : memref<128x128xbf16, #tpu.memory_space<vmem>>, vector<128x128xbf16>
    %cst = arith.constant dense<0.000000e+00> : vector<256x128xf32>
    %2 = tpu.matmul %0, %1, %cst {dimension_numbers = #tpu.dot_dimension_numbers<[1], [0], [0], [1], [0, 0, 1, 1], [], []>} : vector<256x128xbf16>, vector<128x128xbf16>, vector<256x128xf32> -> vector<256x128xf32>
    %c0_3 = arith.constant 0 : index
    %c0_4 = arith.constant 0 : index
    %3 = vector.load %arg3[%c0_3, %c0_4] : memref<1x128xf32, #tpu.memory_space<vmem>>, vector<1x128xf32>
    %4 = vector.broadcast %3 : vector<1x128xf32> to vector<256x128xf32>
    %5 = arith.addf %2, %4 : vector<256x128xf32>
    %cst_5 = arith.constant 0.000000e+00 : f32
    %6 = vector.broadcast %cst_5 : f32 to vector<256x128xf32>
    %7 = arith.maximumf %5, %6 : vector<256x128xf32>
    %8 = arith.truncf %7 : vector<256x128xf32> to vector<256x128xbf16>
    %c0_6 = arith.constant 0 : index
    %c0_7 = arith.constant 0 : index
    %9 = vector.load %arg4[%c0_6, %c0_7] : memref<128x128xbf16, #tpu.memory_space<vmem>>, vector<128x128xbf16>
    %cst_8 = arith.constant dense<0.000000e+00> : vector<256x128xf32>
    %10 = tpu.matmul %8, %9, %cst_8 {dimension_numbers = #tpu.dot_dimension_numbers<[1], [0], [0], [1], [0, 0, 1, 1], [], []>} : vector<256x128xbf16>, vector<128x128xbf16>, vector<256x128xf32> -> vector<256x128xf32>
    %c0_9 = arith.constant 0 : index
    %c0_10 = arith.constant 0 : index
    %11 = vector.load %arg5[%c0_9, %c0_10] : memref<1x128xf32, #tpu.memory_space<vmem>>, vector<1x128xf32>
    %12 = vector.broadcast %11 : vector<1x128xf32> to vector<256x128xf32>
    %13 = arith.addf %10, %12 : vector<256x128xf32>
    %cst_11 = arith.constant 0.000000e+00 : f32
    %14 = vector.broadcast %cst_11 : f32 to vector<256x128xf32>
    %15 = arith.maximumf %13, %14 : vector<256x128xf32>
    %16 = arith.truncf %15 : vector<256x128xf32> to vector<256x128xbf16>
    %c0_12 = arith.constant 0 : index
    %c0_13 = arith.constant 0 : index
    %17 = vector.load %arg6[%c0_12, %c0_13] : memref<128x128xbf16, #tpu.memory_space<vmem>>, vector<128x128xbf16>
    %cst_14 = arith.constant dense<0.000000e+00> : vector<256x128xf32>
    %18 = tpu.matmul %16, %17, %cst_14 {dimension_numbers = #tpu.dot_dimension_numbers<[1], [0], [0], [1], [0, 0, 1, 1], [], []>} : vector<256x128xbf16>, vector<128x128xbf16>, vector<256x128xf32> -> vector<256x128xf32>
    %c0_15 = arith.constant 0 : index
    %c0_16 = arith.constant 0 : index
    %19 = vector.load %arg7[%c0_15, %c0_16] : memref<1x128xf32, #tpu.memory_space<vmem>>, vector<1x128xf32>
    %20 = vector.broadcast %19 : vector<1x128xf32> to vector<256x128xf32>
    %21 = arith.addf %18, %20 : vector<256x128xf32>
    %22 = math.tanh %21 : vector<256x128xf32>
    %cst_17 = arith.constant 1.000000e+00 : f32
    %23 = vector.broadcast %cst_17 : f32 to vector<256x128xf32>
    %24 = arith.mulf %23, %22 : vector<256x128xf32>
    %c0_18 = arith.constant 0 : index
    %c0_19 = arith.constant 0 : index
    %25 = vector.load %arg8[%c0_18, %c0_19] : memref<256x128xf32, #tpu.memory_space<vmem>>, vector<256x128xf32>
    tpu.vector_store %arg8[%c0_18, %c0_19], %24 {strides = array<i32>} : memref<256x128xf32, #tpu.memory_space<vmem>>, vector<256x128xf32>,
    return
  }
  func.func @transform_0(%arg0: i32) -> (i32, i32) {
    %c0_i32 = arith.constant 0 : i32
    %c0_i32_0 = arith.constant 0 : i32
    return %arg0, %c0_i32 : i32, i32
  }
  func.func @transform_1(%arg0: i32) -> (i32, i32) {
    %c0_i32 = arith.constant 0 : i32
    %c0_i32_0 = arith.constant 0 : i32
    %c0_i32_1 = arith.constant 0 : i32
    return %c0_i32, %c0_i32_0 : i32, i32
  }
  func.func @transform_2(%arg0: i32) -> (i32, i32) {
    %c0_i32 = arith.constant 0 : i32
    %c0_i32_0 = arith.constant 0 : i32
    %c0_i32_1 = arith.constant 0 : i32
    return %c0_i32, %c0_i32_0 : i32, i32
  }
  func.func @transform_3(%arg0: i32) -> (i32, i32) {
    %c0_i32 = arith.constant 0 : i32
    %c0_i32_0 = arith.constant 0 : i32
    %c0_i32_1 = arith.constant 0 : i32
    return %c0_i32, %c0_i32_0 : i32, i32
  }
  func.func @transform_4(%arg0: i32) -> (i32, i32) {
    %c0_i32 = arith.constant 0 : i32
    %c0_i32_0 = arith.constant 0 : i32
    %c0_i32_1 = arith.constant 0 : i32
    return %c0_i32, %c0_i32_0 : i32, i32
  }
  func.func @transform_5(%arg0: i32) -> (i32, i32) {
    %c0_i32 = arith.constant 0 : i32
    %c0_i32_0 = arith.constant 0 : i32
    %c0_i32_1 = arith.constant 0 : i32
    return %c0_i32, %c0_i32_0 : i32, i32
  }
  func.func @transform_6(%arg0: i32) -> (i32, i32) {
    %c0_i32 = arith.constant 0 : i32
    %c0_i32_0 = arith.constant 0 : i32
    %c0_i32_1 = arith.constant 0 : i32
    return %c0_i32, %c0_i32_0 : i32, i32
  }
  func.func @transform_7(%arg0: i32) -> (i32, i32) {
    %c0_i32 = arith.constant 0 : i32
    %c0_i32_0 = arith.constant 0 : i32
    return %arg0, %c0_i32 : i32, i32
  }
}

</mosaic_0001>

<bundles_post_ra>
// kernel: tpu_custom_call.1
= control target key start
LH: loop header
LB: loop body
LE: loop exit
PB: predicated region body
PF: predicated region fallthrough
CT: control target
= control target key end

     0   :  { %12 = vsyncpa [#allocation3], 0  ;;  %s1473_s0 = inlined_call_operand.hbm [shape: bf16[256,128], index: 0, kind: input, shape index: {}]   ;;  %s1474_s1 = inlined_call_operand.hbm [shape: bf16[128,128], index: 1, kind: input, shape index: {}]   ;;  %s1475_s2 = inlined_call_operand.vmem [shape: f32[1,128], index: 2, kind: input, shape index: {}]   ;;  %s1476_s3 = inlined_call_operand.hbm [shape: bf16[128,128], index: 3, kind: input, shape index: {}]   ;;  %s1477_s4 = inlined_call_operand.vmem [shape: f32[1,128], index: 4, kind: input, shape index: {}]   ;;  %s1478_s5 = inlined_call_operand.hbm [shape: bf16[128,128], index: 5, kind: input, shape index: {}]   ;;  %s1479_s6 = inlined_call_operand.vmem [shape: f32[1,128], index: 6, kind: input, shape index: {}]   ;;  %s1480_s7 = inlined_call_operand.hbm [shape: f32[256,128], index: 7, kind: output, shape index: {}]  }
   0x1   :  { %13 = vsyncpa [#allocation6], 0 }
   0x2   :  { %14 = vsyncpa [#allocation9], 0 }
   0x3   :  { %15 = vsyncpa [#allocation4], 0  ;;  %s33_s26 = sshll.u32 %s1474_s1, 4  ;;  %s1298_s27 = smov [#allocation5]   ;;  %s34_s26 = int_to_ptr.hbm [resolvable:$true] %s33_s26 }
   0x4   :  { %s35_s28 = sshll.u32 %s1298_s27, 4  ;;  %s20_s8 = sshll.u32 %s1473_s0, 4  ;;  %s36_s28 = int_to_ptr.vmem [resolvable:$true] %s35_s28  ;;  %s21_s8 = int_to_ptr.hbm [resolvable:$true] %s20_s8 }
   0x5   :  { %s1299_s9 = smov 64   ;;  %s1300_s10 = smov 4  }
   0x6   :  { %41 = dma.hbm_to_vmem [thread:$0]  %s34_s26, 1024, %s36_s28, [#allocation6], %s1299_s9, %s1299_s9, %s1300_s10  }
   0x7   :  { %s1301_s11 = smov [#allocation2]   ;;  %s48_s15 = sshll.u32 %s1476_s3, 4  ;;  %s49_s15 = int_to_ptr.hbm [resolvable:$true] %s48_s15 }
   0x8   :  { %s22_s12 = sshll.u32 %s1301_s11, 4  ;;  %s63_s17 = sshll.u32 %s1478_s5, 4  ;;  %s23_s12 = int_to_ptr.vmem [resolvable:$true] %s22_s12  ;;  %s64_s17 = int_to_ptr.hbm [resolvable:$true] %s63_s17 }
   0x9   :  { %28 = dma.hbm_to_vmem [thread:$0]  %s21_s8, 2048, %s23_s12, [#allocation3], %s1299_s9, %s1299_s9, %s1300_s10  }
   0xa   :  { %s1302_s18 = smov [#allocation7]   ;;  %s1303_s0 = smov [#allocation8]  }
   0xb   :  { %s50_s19 = sshll.u32 %s1302_s18, 4  ;;  %s65_s20 = sshll.u32 %s1303_s0, 4  ;;  %s51_s19 = int_to_ptr.vmem [resolvable:$true] %s50_s19  ;;  %s66_s20 = int_to_ptr.vmem [resolvable:$true] %s65_s20 }
   0xc   :  { %56 = dma.hbm_to_vmem [thread:$0]  %s49_s15, 1024, %s51_s19, [#allocation6], %s1299_s9, %s1299_s9, %s1300_s10  }
   0xd   :  { %71 = dma.hbm_to_vmem [thread:$0]  %s64_s17, 1024, %s66_s20, [#allocation9], %s1299_s9, %s1299_s9, %s1300_s10  }
   0xe   :  { %1290 = dma.done.wait [#allocation3], 2048  }
   0xf   :  { %1291 = vsyncadd [#allocation3], 4294965248 }
  0x10   :  { %1292 = dma.done.wait [#allocation6], 2048  }
  0x11   :  { %1293 = vsyncadd [#allocation6], 4294965248 }
  0x12   :  { %1294 = dma.done.wait [#allocation9], 1024  }
  0x13   :  { %1295 = vsyncadd [#allocation9], 4294966272  ;;  %v1053_v0 = vld [vmem:[#allocation5 + $0x38] sm:$0xff]  ;;  %v1052_v1 = vld [vmem:[#allocation5 + $0x30] sm:$0xff]  ;;  %s855_s26 = sshll.u32 %s1480_s7, 4  ;;  %s1305_s27 = smov 128   ;;  %s856_s26 = int_to_ptr.hbm [resolvable:$true] %s855_s26 }
  0x14   :  { %286 = vmatpush.bf16.msra.mxu0 %v1053_v0  ;;  %1070 = vmatpush.bf16.msra.mxu3 %v1053_v0  ;;  %v1051_v2 = vld [vmem:[#allocation5 + $0x28] sm:$0xff]  ;;  %v1050_v3 = vld [vmem:[#allocation5 + $0x20] sm:$0xff]  ;;  %v1049_v4 = vld [vmem:[#allocation5 + $0x18] sm:$0xff]  ;;  %s1306_s28 = smov 8  }
  0x15   :  { %v1048_v5 = vld [vmem:[#allocation5 + $0x10] sm:$0xff]  ;;  %v1047_v6 = vld [vmem:[#allocation5 + $0x8] sm:$0xff]  ;;  %v1046_v7 = vld [vmem:[#allocation5] sm:$0xff] }
  0x16   :  { %v1030_v8 = vld [vmem:[#allocation2] sm:$0xff]  ;;  %v1031_v9 = vld [vmem:[#allocation2 + $0x8] sm:$0xff]  ;;  %v1032_v10 = vld [vmem:[#allocation2 + $0x10] sm:$0xff] }
  0x17   :  { %v1033_v11 = vld [vmem:[#allocation2 + $0x18] sm:$0xff]  ;;  %v1042_v12 = vld [vmem:[#allocation2 + $0x60] sm:$0xff]  ;;  %v1043_v14 = vld [vmem:[#allocation2 + $0x68] sm:$0xff] }
  0x18   :  { %287 = vmatpush.bf16.msra.mxu0 %v1052_v1  ;;  %1071 = vmatpush.bf16.msra.mxu3 %v1052_v1  ;;  %v1034_v13 = vld [vmem:[#allocation2 + $0x20] sm:$0xff]  ;;  %v1061_v15 = vld [vmem:[#allocation7 + $0x38] sm:$0xff]  ;;  %v1035_v16 = vld [vmem:[#allocation2 + $0x28] sm:$0xff] }
  0x19   :  { %491 = vmatpush.bf16.msra.mxu1 %v1061_v15  ;;  %v1060_v17 = vld [vmem:[#allocation7 + $0x30] sm:$0xff]  ;;  %v1059_v19 = vld [vmem:[#allocation7 + $0x28] sm:$0xff]  ;;  %v1058_v20 = vld [vmem:[#allocation7 + $0x20] sm:$0xff] }
  0x1a   :  { %v1044_v18 = vld [vmem:[#allocation2 + $0x70] sm:$0xff]  ;;  %v1057_v21 = vld [vmem:[#allocation7 + $0x18] sm:$0xff]  ;;  %v1055_v24 = vld [vmem:[#allocation7 + $0x8] sm:$0xff] }
  0x1b   :  { %v1036_v22 = vld [vmem:[#allocation2 + $0x30] sm:$0xff]  ;;  %v1054_v25 = vld [vmem:[#allocation7] sm:$0xff]  ;;  %v1045_v26 = vld [vmem:[#allocation2 + $0x78] sm:$0xff] }
  0x1c   :  { %288 = vmatpush.bf16.msra.mxu0 %v1051_v2  ;;  %1072 = vmatpush.bf16.msra.mxu3 %v1051_v2  ;;  %v1056_v23 = vld [vmem:[#allocation7 + $0x10] sm:$0xff]  ;;  %v1037_v27 = vld [vmem:[#allocation2 + $0x38] sm:$0xff]  ;;  %v1038_v28 = vld [vmem:[#allocation2 + $0x40] sm:$0xff] }
  0x1d   :  { %492 = vmatpush.bf16.msra.mxu1 %v1060_v17  ;;  %v1362_v30 = vld [vmem:[%s1475_s2] ss:$0 sm:$0xff]  ;;  %v1039_v37 = vld [vmem:[#allocation2 + $0x48] sm:$0xff]  ;;  %v1040_v45 = vld [vmem:[#allocation2 + $0x50] sm:$0xff] }
  0x1e   :  { %v1041_v53 = vld [vmem:[#allocation2 + $0x58] sm:$0xff] }
  0x20   :  { %289 = vmatpush.bf16.msra.mxu0 %v1050_v3  ;;  %1073 = vmatpush.bf16.msra.mxu3 %v1050_v3 }
  0x21   :  { %493 = vmatpush.bf16.msra.mxu1 %v1059_v19 }
  0x24   :  { %290 = vmatpush.bf16.msra.mxu0 %v1049_v4  ;;  %1074 = vmatpush.bf16.msra.mxu3 %v1049_v4 }
  0x25   :  { %494 = vmatpush.bf16.msra.mxu1 %v1058_v20 }
  0x28   :  { %291 = vmatpush.bf16.msra.mxu0 %v1048_v5  ;;  %1075 = vmatpush.bf16.msra.mxu3 %v1048_v5 }
  0x29   :  { %495 = vmatpush.bf16.msra.mxu1 %v1057_v21 }
  0x2c   :  { %292 = vmatpush.bf16.msra.mxu0 %v1047_v6  ;;  %1076 = vmatpush.bf16.msra.mxu3 %v1047_v6 }
  0x2d   :  { %496 = vmatpush.bf16.msra.mxu1 %v1056_v23 }
  0x30   :  { %293 = vmatpush.bf16.msra.mxu0 %v1046_v7  ;;  %1077 = vmatpush.bf16.msra.mxu3 %v1046_v7 }
  0x31   :  { %497 = vmatpush.bf16.msra.mxu1 %v1055_v24 }
  0x33   :  { %294 = vmatmul.bf16.vlgmr.msra.gmra.mxu0 %v1030_v8  ;;  %354 = vmatmul.bf16.vlgmr.msra.gmra.mxu3 %v1042_v12 }
  0x34   :  { %1078 = vmatpush.bf16.msrb.mxu3 %v1061_v15 }
  0x35   :  { %498 = vmatpush.bf16.msra.mxu1 %v1054_v25 }
  0x38   :  { %1079 = vmatpush.bf16.msrb.mxu3 %v1060_v17 }
  0x3c   :  { %1080 = vmatpush.bf16.msrb.mxu3 %v1059_v19 }
  0x40   :  { %1081 = vmatpush.bf16.msrb.mxu3 %v1058_v20 }
  0x43   :  { %299 = vmatmul.bf16.gmra.mxu0 %v1031_v9  ;;  %359 = vmatmul.bf16.gmra.mxu3 %v1043_v14 }
  0x44   :  { %1082 = vmatpush.bf16.msrb.mxu3 %v1057_v21 }
  0x48   :  { %1083 = vmatpush.bf16.msrb.mxu3 %v1056_v23 }
  0x4c   :  { %1084 = vmatpush.bf16.msrb.mxu3 %v1055_v24 }
  0x50   :  { %1085 = vmatpush.bf16.msrb.mxu3 %v1054_v25  ;;  %v1068_v25 = vld [vmem:[#allocation8 + $0x30] sm:$0xff] }
  0x53   :  { %304 = vmatmul.bf16.gmra.mxu0 %v1032_v10  ;;  %364 = vmatmul.bf16.gmra.mxu3 %v1044_v18  ;;  %v1069_v18 = vld [vmem:[#allocation8 + $0x38] sm:$0xff] }
  0x54   :  { %696 = vmatpush.bf16.msra.mxu2 %v1069_v18  ;;  %1086 = vmatpush.bf16.msra.mxu3 %v1069_v18 }
  0x58   :  { %697 = vmatpush.bf16.msra.mxu2 %v1068_v25  ;;  %1087 = vmatpush.bf16.msra.mxu3 %v1068_v25 }
  0x63   :  { %309 = vmatmul.bf16.gmra.mxu0 %v1033_v11  ;;  %369 = vmatmul.bf16.gmra.mxu3 %v1045_v26 }
  0x73   :  { %314 = vmatmul.bf16.gmra.mxu0 %v1034_v13 }
  0x83   :  { %319 = vmatmul.bf16.gmra.mxu0 %v1035_v16 }
  0x93   :  { %324 = vmatmul.bf16.gmra.mxu0 %v1036_v22 }
  0xa3   :  { %329 = vmatmul.bf16.gmra.mxu0 %v1037_v27 }
  0xb0   :  { %v295_v29 = vpop.f32.mrf.mxu0 }
  0xb1   :  { %v296_v31 = vadd.f32 %v1362_v30, %v295_v29  ;;  %v1067_v29 = vld [vmem:[#allocation8 + $0x28] sm:$0xff] }
  0xb2   :  { %698 = vmatpush.bf16.msra.mxu2 %v1067_v29  ;;  %1088 = vmatpush.bf16.msra.mxu3 %v1067_v29 }
  0xb3   :  { %334 = vmatmul.bf16.gmra.mxu0 %v1038_v28  ;;  %v375_v34 = vmax.f32 %v296_v31, 0.0  ;;  %v1066_v31 = vld [vmem:[#allocation8 + $0x20] sm:$0xff] }
  0xb6   :  { %v355_v62 = vpop.f32.mrf.mxu3  ;;  %699 = vmatpush.bf16.msra.mxu2 %v1066_v31  ;;  %1089 = vmatpush.bf16.msra.mxu3 %v1066_v31 }
  0xb7   :  { %v356_v0 = vadd.f32 %v1362_v30, %v355_v62 }
  0xb8   :  { %v297_v32 = vpop.f32.mrf.mxu0 }
  0xb9   :  { %v298_v33 = vadd.f32 %v1362_v30, %v297_v32  ;;  %v399_v6 = vmax.f32 %v356_v0, 0.0 }
  0xbb   :  { %v376_v35 = vmax.f32 %v298_v33, 0.0 }
  0xbd   :  { %v407_v36 = vpack.c.bf16 %v376_v35, %v375_v34 }
  0xbe   :  { %v357_v3 = vpop.f32.mrf.mxu3 }
  0xbf   :  { %499 = vmatmul.bf16.vlgmr.msra.gmra.mxu1 %v407_v36  ;;  %v358_v7 = vadd.f32 %v1362_v30, %v357_v3 }
  0xc0   :  { %v300_v38 = vpop.f32.mrf.mxu0 }
  0xc1   :  { %v301_v39 = vadd.f32 %v1362_v30, %v300_v38  ;;  %v400_v9 = vmax.f32 %v358_v7, 0.0 }
  0xc3   :  { %339 = vmatmul.bf16.gmra.mxu0 %v1039_v37  ;;  %v377_v42 = vmax.f32 %v301_v39, 0.0  ;;  %v419_v10 = vpack.c.bf16 %v400_v9, %v399_v6  ;;  %v1065_v37 = vld [vmem:[#allocation8 + $0x18] sm:$0xff]  ;;  %v1393_v6 = vld [vmem:[%s1477_s4] ss:$0 sm:$0xff] }
  0xc4   :  { %700 = vmatpush.bf16.msra.mxu2 %v1065_v37  ;;  %1090 = vmatpush.bf16.msra.mxu3 %v1065_v37 }
  0xc5   :  { %559 = vmatmul.bf16.vlgmr.msrb.gmra.mxu3 %v419_v10 }
  0xc6   :  { %v360_v12 = vpop.f32.mrf.mxu3 }
  0xc7   :  { %v361_v14 = vadd.f32 %v1362_v30, %v360_v12 }
  0xc8   :  { %v302_v40 = vpop.f32.mrf.mxu0 }
  0xc9   :  { %v303_v41 = vadd.f32 %v1362_v30, %v302_v40  ;;  %v401_v21 = vmax.f32 %v361_v14, 0.0 }
  0xcb   :  { %v378_v43 = vmax.f32 %v303_v41, 0.0 }
  0xcd   :  { %v408_v44 = vpack.c.bf16 %v378_v43, %v377_v42 }
  0xce   :  { %v362_v17 = vpop.f32.mrf.mxu3 }
  0xcf   :  { %504 = vmatmul.bf16.gmra.mxu1 %v408_v44  ;;  %v363_v22 = vadd.f32 %v1362_v30, %v362_v17  ;;  %v1064_v44 = vld [vmem:[#allocation8 + $0x10] sm:$0xff] }
  0xd0   :  { %v305_v46 = vpop.f32.mrf.mxu0  ;;  %701 = vmatpush.bf16.msra.mxu2 %v1064_v44  ;;  %1091 = vmatpush.bf16.msra.mxu3 %v1064_v44 }
  0xd1   :  { %v306_v47 = vadd.f32 %v1362_v30, %v305_v46  ;;  %v402_v24 = vmax.f32 %v363_v22, 0.0 }
  0xd3   :  { %344 = vmatmul.bf16.gmra.mxu0 %v1040_v45  ;;  %v379_v50 = vmax.f32 %v306_v47, 0.0  ;;  %v420_v26 = vpack.c.bf16 %v402_v24, %v401_v21 }
  0xd5   :  { %564 = vmatmul.bf16.gmra.mxu3 %v420_v26 }
  0xd6   :  { %v365_v28 = vpop.f32.mrf.mxu3 }
  0xd7   :  { %v366_v33 = vadd.f32 %v1362_v30, %v365_v28 }
  0xd8   :  { %v307_v48 = vpop.f32.mrf.mxu0 }
  0xd9   :  { %v308_v49 = vadd.f32 %v1362_v30, %v307_v48  ;;  %v403_v40 = vmax.f32 %v366_v33, 0.0  ;;  %v1063_v48 = vld [vmem:[#allocation8 + $0x8] sm:$0xff] }
  0xda   :  { %702 = vmatpush.bf16.msra.mxu2 %v1063_v48  ;;  %1092 = vmatpush.bf16.msra.mxu3 %v1063_v48 }
  0xdb   :  { %v380_v51 = vmax.f32 %v308_v49, 0.0  ;;  %v1062_v49 = vld [vmem:[#allocation8] sm:$0xff] }
  0xdd   :  { %v409_v52 = vpack.c.bf16 %v380_v51, %v379_v50 }
  0xde   :  { %v367_v36 = vpop.f32.mrf.mxu3  ;;  %703 = vmatpush.bf16.msra.mxu2 %v1062_v49  ;;  %1093 = vmatpush.bf16.msra.mxu3 %v1062_v49 }
  0xdf   :  { %509 = vmatmul.bf16.gmra.mxu1 %v409_v52  ;;  %v368_v41 = vadd.f32 %v1362_v30, %v367_v36 }
  0xe0   :  { %v310_v54 = vpop.f32.mrf.mxu0 }
  0xe1   :  { %v311_v55 = vadd.f32 %v1362_v30, %v310_v54  ;;  %v404_v43 = vmax.f32 %v368_v41, 0.0 }
  0xe3   :  { %349 = vmatmul.bf16.gmra.mxu0 %v1041_v53  ;;  %v381_v58 = vmax.f32 %v311_v55, 0.0  ;;  %v421_v45 = vpack.c.bf16 %v404_v43, %v403_v40 }
  0xe5   :  { %569 = vmatmul.bf16.gmra.mxu3 %v421_v45 }
  0xe6   :  { %v370_v47 = vpop.f32.mrf.mxu3 }
  0xe7   :  { %v371_v51 = vadd.f32 %v1362_v30, %v370_v47 }
  0xe8   :  { %v312_v56 = vpop.f32.mrf.mxu0 }
  0xe9   :  { %v313_v57 = vadd.f32 %v1362_v30, %v312_v56 }
  0xeb   :  { %v382_v59 = vmax.f32 %v313_v57, 0.0  ;;  %v405_v57 = vmax.f32 %v371_v51, 0.0 }
  0xed   :  { %v410_v60 = vpack.c.bf16 %v382_v59, %v381_v58 }
  0xee   :  { %v372_v54 = vpop.f32.mrf.mxu3 }
  0xef   :  { %514 = vmatmul.bf16.gmra.mxu1 %v410_v60  ;;  %v373_v58 = vadd.f32 %v1362_v30, %v372_v54 }
  0xf0   :  { %v315_v61 = vpop.f32.mrf.mxu0 }
  0xf1   :  { %v316_v63 = vadd.f32 %v1362_v30, %v315_v61  ;;  %v406_v60 = vmax.f32 %v373_v58, 0.0 }
  0xf3   :  { %v383_v4 = vmax.f32 %v316_v63, 0.0  ;;  %v422_v61 = vpack.c.bf16 %v406_v60, %v405_v57 }
  0xf5   :  { %574 = vmatmul.bf16.gmra.mxu3 %v422_v61 }
  0xf8   :  { %v317_v1 = vpop.f32.mrf.mxu0 }
  0xf9   :  { %v318_v2 = vadd.f32 %v1362_v30, %v317_v1 }
  0xfb   :  { %v384_v5 = vmax.f32 %v318_v2, 0.0 }
  0xfd   :  { %v411_v8 = vpack.c.bf16 %v384_v5, %v383_v4 }
  0xff   :  { %519 = vmatmul.bf16.gmra.mxu1 %v411_v8 }
 0x100   :  { %v320_v11 = vpop.f32.mrf.mxu0 }
 0x101   :  { %v321_v13 = vadd.f32 %v1362_v30, %v320_v11 }
 0x103   :  { %v385_v19 = vmax.f32 %v321_v13, 0.0 }
 0x108   :  { %v322_v15 = vpop.f32.mrf.mxu0 }
 0x109   :  { %v323_v16 = vadd.f32 %v1362_v30, %v322_v15 }
 0x10b   :  { %v386_v20 = vmax.f32 %v323_v16, 0.0 }
 0x10d   :  { %v412_v23 = vpack.c.bf16 %v386_v20, %v385_v19 }
 0x10f   :  { %524 = vmatmul.bf16.gmra.mxu1 %v412_v23 }
 0x110   :  { %v325_v27 = vpop.f32.mrf.mxu0 }
 0x111   :  { %v326_v32 = vadd.f32 %v1362_v30, %v325_v27 }
 0x113   :  { %v387_v38 = vmax.f32 %v326_v32, 0.0 }
 0x118   :  { %v327_v34 = vpop.f32.mrf.mxu0 }
 0x119   :  { %v328_v35 = vadd.f32 %v1362_v30, %v327_v34 }
 0x11b   :  { %v388_v39 = vmax.f32 %v328_v35, 0.0 }
 0x11d   :  { %v413_v42 = vpack.c.bf16 %v388_v39, %v387_v38 }
 0x11f   :  { %529 = vmatmul.bf16.gmra.mxu1 %v413_v42 }
 0x120   :  { %v330_v46 = vpop.f32.mrf.mxu0 }
 0x121   :  { %v331_v50 = vadd.f32 %v1362_v30, %v330_v46 }
 0x123   :  { %v389_v55 = vmax.f32 %v331_v50, 0.0 }
 0x128   :  { %v332_v52 = vpop.f32.mrf.mxu0 }
 0x129   :  { %v333_v53 = vadd.f32 %v1362_v30, %v332_v52 }
 0x12b   :  { %v390_v56 = vmax.f32 %v333_v53, 0.0 }
 0x12d   :  { %v414_v59 = vpack.c.bf16 %v390_v56, %v389_v55 }
 0x12f   :  { %534 = vmatmul.bf16.gmra.mxu1 %v414_v59 }
 0x130   :  { %v335_v62 = vpop.f32.mrf.mxu0 }
 0x131   :  { %v336_v63 = vadd.f32 %v1362_v30, %v335_v62 }
 0x133   :  { %v391_v2 = vmax.f32 %v336_v63, 0.0 }
 0x138   :  { %v337_v0 = vpop.f32.mrf.mxu0 }
 0x139   :  { %v338_v1 = vadd.f32 %v1362_v30, %v337_v0 }
 0x13b   :  { %v392_v3 = vmax.f32 %v338_v1, 0.0 }
 0x13c   :  { %v500_v4 = vpop.f32.mrf.mxu1 }
 0x13d   :  { %v415_v5 = vpack.c.bf16 %v392_v3, %v391_v2  ;;  %v501_v8 = vadd.f32 %v1393_v6, %v500_v4 }
 0x13f   :  { %539 = vmatmul.bf16.gmra.mxu1 %v415_v5  ;;  %v580_v11 = vmax.f32 %v501_v8, 0.0 }
 0x140   :  { %v340_v7 = vpop.f32.mrf.mxu0 }
 0x141   :  { %v341_v12 = vadd.f32 %v1362_v30, %v340_v7 }
 0x143   :  { %v393_v17 = vmax.f32 %v341_v12, 0.0 }
 0x144   :  { %v502_v9 = vpop.f32.mrf.mxu1 }
 0x145   :  { %v503_v10 = vadd.f32 %v1393_v6, %v502_v9 }
 0x147   :  { %v581_v13 = vmax.f32 %v503_v10, 0.0 }
 0x148   :  { %v342_v14 = vpop.f32.mrf.mxu0  ;;  %v560_v58 = vpop.f32.mrf.mxu3 }
 0x149   :  { %v343_v15 = vadd.f32 %v1362_v30, %v342_v14  ;;  %v612_v16 = vpack.c.bf16 %v581_v13, %v580_v11  ;;  %v561_v63 = vadd.f32 %v1393_v6, %v560_v58 }
 0x14b   :  { %v394_v18 = vmax.f32 %v343_v15, 0.0  ;;  %704 = vmatmul.bf16.vlgmr.msra.gmra.mxu2 %v612_v16  ;;  %v604_v2 = vmax.f32 %v561_v63, 0.0 }
 0x14c   :  { %v505_v19 = vpop.f32.mrf.mxu1 }
 0x14d   :  { %v416_v20 = vpack.c.bf16 %v394_v18, %v393_v17  ;;  %v506_v22 = vadd.f32 %v1393_v6, %v505_v19 }
 0x14f   :  { %544 = vmatmul.bf16.gmra.mxu1 %v416_v20  ;;  %v582_v25 = vmax.f32 %v506_v22, 0.0 }
 0x150   :  { %v345_v21 = vpop.f32.mrf.mxu0  ;;  %v562_v1 = vpop.f32.mrf.mxu3 }
 0x151   :  { %v346_v26 = vadd.f32 %v1362_v30, %v345_v21  ;;  %v563_v3 = vadd.f32 %v1393_v6, %v562_v1 }
 0x153   :  { %v395_v32 = vmax.f32 %v346_v26, 0.0  ;;  %v605_v4 = vmax.f32 %v563_v3, 0.0 }
 0x154   :  { %v507_v23 = vpop.f32.mrf.mxu1 }
 0x155   :  { %v508_v24 = vadd.f32 %v1393_v6, %v507_v23  ;;  %v624_v5 = vpack.c.bf16 %v605_v4, %v604_v2 }
 0x157   :  { %v583_v27 = vmax.f32 %v508_v24, 0.0  ;;  %764 = vmatmul.bf16.vlgmr.msra.gmra.mxu3 %v624_v5 }
 0x158   :  { %v347_v28 = vpop.f32.mrf.mxu0  ;;  %v565_v9 = vpop.f32.mrf.mxu3 }
 0x159   :  { %v348_v29 = vadd.f32 %v1362_v30, %v347_v28  ;;  %v613_v31 = vpack.c.bf16 %v583_v27, %v582_v25  ;;  %v566_v14 = vadd.f32 %v1393_v6, %v565_v9 }
 0x15b   :  { %v396_v33 = vmax.f32 %v348_v29, 0.0  ;;  %709 = vmatmul.bf16.gmra.mxu2 %v613_v31  ;;  %v606_v17 = vmax.f32 %v566_v14, 0.0 }
 0x15c   :  { %v510_v34 = vpop.f32.mrf.mxu1 }
 0x15d   :  { %v417_v35 = vpack.c.bf16 %v396_v33, %v395_v32  ;;  %v511_v37 = vadd.f32 %v1393_v6, %v510_v34 }
 0x15f   :  { %549 = vmatmul.bf16.gmra.mxu1 %v417_v35  ;;  %v584_v40 = vmax.f32 %v511_v37, 0.0 }
 0x160   :  { %v350_v36 = vpop.f32.mrf.mxu0  ;;  %v567_v16 = vpop.f32.mrf.mxu3 }
 0x161   :  { %v351_v41 = vadd.f32 %v1362_v30, %v350_v36  ;;  %v568_v18 = vadd.f32 %v1393_v6, %v567_v16 }
 0x163   :  { %v397_v46 = vmax.f32 %v351_v41, 0.0  ;;  %v607_v19 = vmax.f32 %v568_v18, 0.0 }
 0x164   :  { %v512_v38 = vpop.f32.mrf.mxu1 }
 0x165   :  { %v513_v39 = vadd.f32 %v1393_v6, %v512_v38  ;;  %v625_v20 = vpack.c.bf16 %v607_v19, %v606_v17 }
 0x167   :  { %v585_v42 = vmax.f32 %v513_v39, 0.0  ;;  %769 = vmatmul.bf16.gmra.mxu3 %v625_v20 }
 0x168   :  { %v352_v43 = vpop.f32.mrf.mxu0  ;;  %v570_v23 = vpop.f32.mrf.mxu3 }
 0x169   :  { %v353_v44 = vadd.f32 %v1362_v30, %v352_v43  ;;  %v614_v45 = vpack.c.bf16 %v585_v42, %v584_v40  ;;  %v571_v28 = vadd.f32 %v1393_v6, %v570_v23 }
 0x16b   :  { %v398_v47 = vmax.f32 %v353_v44, 0.0  ;;  %714 = vmatmul.bf16.gmra.mxu2 %v614_v45  ;;  %v608_v32 = vmax.f32 %v571_v28, 0.0 }
 0x16c   :  { %v515_v48 = vpop.f32.mrf.mxu1 }
 0x16d   :  { %v418_v49 = vpack.c.bf16 %v398_v47, %v397_v46  ;;  %v516_v50 = vadd.f32 %v1393_v6, %v515_v48 }
 0x16f   :  { %554 = vmatmul.bf16.gmra.mxu1 %v418_v49  ;;  %v586_v53 = vmax.f32 %v516_v50, 0.0 }
 0x170   :  { %v572_v31 = vpop.f32.mrf.mxu3 }
 0x171   :  { %v573_v33 = vadd.f32 %v1393_v6, %v572_v31 }
 0x173   :  { %v609_v34 = vmax.f32 %v573_v33, 0.0 }
 0x174   :  { %v517_v51 = vpop.f32.mrf.mxu1 }
 0x175   :  { %v518_v52 = vadd.f32 %v1393_v6, %v517_v51  ;;  %v626_v35 = vpack.c.bf16 %v609_v34, %v608_v32 }
 0x177   :  { %v587_v54 = vmax.f32 %v518_v52, 0.0  ;;  %774 = vmatmul.bf16.gmra.mxu3 %v626_v35 }
 0x178   :  { %v575_v38 = vpop.f32.mrf.mxu3 }
 0x179   :  { %v615_v55 = vpack.c.bf16 %v587_v54, %v586_v53  ;;  %v576_v43 = vadd.f32 %v1393_v6, %v575_v38 }
 0x17b   :  { %719 = vmatmul.bf16.gmra.mxu2 %v615_v55  ;;  %v610_v46 = vmax.f32 %v576_v43, 0.0 }
 0x17c   :  { %v520_v56 = vpop.f32.mrf.mxu1 }
 0x17d   :  { %v521_v57 = vadd.f32 %v1393_v6, %v520_v56  ;;  %v1430_v56 = vld [vmem:[%s1479_s6] ss:$0 sm:$0xff]  ;;  %s1304_s6 = smov [#allocation10]  }
 0x17e   :  { %s853_s23 = sshll.u32 %s1304_s6, 4  ;;  %s854_s23 = int_to_ptr.vmem [resolvable:$true] %s853_s23 }
 0x17f   :  { %v588_v60 = vmax.f32 %v521_v57, 0.0 }
 0x180   :  { %v577_v45 = vpop.f32.mrf.mxu3 }
 0x181   :  { %v578_v47 = vadd.f32 %v1393_v6, %v577_v45 }
 0x183   :  { %v611_v48 = vmax.f32 %v578_v47, 0.0 }
 0x184   :  { %v522_v30 = vpop.f32.mrf.mxu1 }
 0x185   :  { %v523_v59 = vadd.f32 %v1393_v6, %v522_v30  ;;  %v627_v49 = vpack.c.bf16 %v611_v48, %v610_v46 }
 0x187   :  { %v589_v61 = vmax.f32 %v523_v59, 0.0  ;;  %779 = vmatmul.bf16.gmra.mxu3 %v627_v49 }
 0x189   :  { %v616_v62 = vpack.c.bf16 %v589_v61, %v588_v60 }
 0x18b   :  { %724 = vmatmul.bf16.gmra.mxu2 %v616_v62 }
 0x18c   :  { %v525_v0 = vpop.f32.mrf.mxu1 }
 0x18d   :  { %v526_v7 = vadd.f32 %v1393_v6, %v525_v0 }
 0x18f   :  { %v590_v11 = vmax.f32 %v526_v7, 0.0 }
 0x194   :  { %v527_v8 = vpop.f32.mrf.mxu1 }
 0x195   :  { %v528_v10 = vadd.f32 %v1393_v6, %v527_v8 }
 0x197   :  { %v591_v12 = vmax.f32 %v528_v10, 0.0 }
 0x199   :  { %v617_v13 = vpack.c.bf16 %v591_v12, %v590_v11 }
 0x19b   :  { %729 = vmatmul.bf16.gmra.mxu2 %v617_v13 }
 0x19c   :  { %v530_v15 = vpop.f32.mrf.mxu1 }
 0x19d   :  { %v531_v21 = vadd.f32 %v1393_v6, %v530_v15 }
 0x19f   :  { %v592_v25 = vmax.f32 %v531_v21, 0.0 }
 0x1a4   :  { %v532_v22 = vpop.f32.mrf.mxu1 }
 0x1a5   :  { %v533_v24 = vadd.f32 %v1393_v6, %v532_v22 }
 0x1a7   :  { %v593_v26 = vmax.f32 %v533_v24, 0.0 }
 0x1a9   :  { %v618_v27 = vpack.c.bf16 %v593_v26, %v592_v25 }
 0x1ab   :  { %734 = vmatmul.bf16.gmra.mxu2 %v618_v27 }
 0x1ac   :  { %v535_v29 = vpop.f32.mrf.mxu1 }
 0x1ad   :  { %v536_v36 = vadd.f32 %v1393_v6, %v535_v29 }
 0x1af   :  { %v594_v40 = vmax.f32 %v536_v36, 0.0 }
 0x1b4   :  { %v537_v37 = vpop.f32.mrf.mxu1 }
 0x1b5   :  { %v538_v39 = vadd.f32 %v1393_v6, %v537_v37 }
 0x1b7   :  { %v595_v41 = vmax.f32 %v538_v39, 0.0 }
 0x1b9   :  { %v619_v42 = vpack.c.bf16 %v595_v41, %v594_v40 }
 0x1bb   :  { %739 = vmatmul.bf16.gmra.mxu2 %v619_v42 }
 0x1bc   :  { %v540_v44 = vpop.f32.mrf.mxu1 }
 0x1bd   :  { %v541_v50 = vadd.f32 %v1393_v6, %v540_v44 }
 0x1bf   :  { %v596_v53 = vmax.f32 %v541_v50, 0.0 }
 0x1c4   :  { %v542_v51 = vpop.f32.mrf.mxu1 }
 0x1c5   :  { %v543_v52 = vadd.f32 %v1393_v6, %v542_v51 }
 0x1c7   :  { %v597_v54 = vmax.f32 %v543_v52, 0.0 }
 0x1c9   :  { %v620_v55 = vpack.c.bf16 %v597_v54, %v596_v53 }
 0x1cb   :  { %744 = vmatmul.bf16.gmra.mxu2 %v620_v55 }
 0x1cc   :  { %v545_v57 = vpop.f32.mrf.mxu1 }
 0x1cd   :  { %v546_v59 = vadd.f32 %v1393_v6, %v545_v57 }
 0x1ce   :  { %v705_v30 = vpop.f32.mrf.mxu2 }
 0x1cf   :  { %v706_v58 = vadd.f32 %v1430_v56, %v705_v30  ;;  %v598_v0 = vmax.f32 %v546_v59, 0.0 }
 0x1d1   :  { %1106 = vtanh.f32 %v706_v58 }
 0x1d4   :  { %v547_v60 = vpop.f32.mrf.mxu1 }
 0x1d5   :  { %v548_v61 = vadd.f32 %v1393_v6, %v547_v60 }
 0x1d6   :  { %v707_v62 = vpop.f32.mrf.mxu2 }
 0x1d7   :  { %v1107_v63 = vpop.eup %1106  ;;  %v599_v1 = vmax.f32 %v548_v61, 0.0  ;;  %v708_v2 = vadd.f32 %v1430_v56, %v707_v62 }
 0x1d8   :  { %817 = vst [vmem:[#allocation10] sm:$0xff] %v1107_v63 }
 0x1d9   :  { %1108 = vtanh.f32 %v708_v2  ;;  %v621_v3 = vpack.c.bf16 %v599_v1, %v598_v0 }
 0x1da   :  { %v765_v41 = vpop.f32.mrf.mxu3 }
 0x1db   :  { %749 = vmatmul.bf16.gmra.mxu2 %v621_v3  ;;  %v766_v48 = vadd.f32 %v1430_v56, %v765_v41 }
 0x1dc   :  { %v550_v4 = vpop.f32.mrf.mxu1 }
 0x1dd   :  { %v551_v9 = vadd.f32 %v1393_v6, %v550_v4 }
 0x1de   :  { %v710_v5 = vpop.f32.mrf.mxu2 }
 0x1df   :  { %v1109_v7 = vpop.eup %1108  ;;  %v711_v8 = vadd.f32 %v1430_v56, %v710_v5  ;;  %v600_v14 = vmax.f32 %v551_v9, 0.0 }
 0x1e0   :  { %818 = vst [vmem:[#allocation10 + $0x8] sm:$0xff] %v1109_v7 }
 0x1e1   :  { %1110 = vtanh.f32 %v711_v8 }
 0x1e2   :  { %v767_v45 = vpop.f32.mrf.mxu3 }
 0x1e3   :  { %v768_v49 = vadd.f32 %v1430_v56, %v767_v45 }
 0x1e4   :  { %v552_v10 = vpop.f32.mrf.mxu1 }
 0x1e5   :  { %v553_v11 = vadd.f32 %v1393_v6, %v552_v10 }
 0x1e6   :  { %v712_v12 = vpop.f32.mrf.mxu2 }
 0x1e7   :  { %v1111_v13 = vpop.eup %1110  ;;  %v601_v15 = vmax.f32 %v553_v11, 0.0  ;;  %v713_v16 = vadd.f32 %v1430_v56, %v712_v12 }
 0x1e8   :  { %819 = vst [vmem:[#allocation10 + $0x10] sm:$0xff] %v1111_v13 }
 0x1e9   :  { %1112 = vtanh.f32 %v713_v16  ;;  %v622_v17 = vpack.c.bf16 %v601_v15, %v600_v14 }
 0x1ea   :  { %v770_v51 = vpop.f32.mrf.mxu3 }
 0x1eb   :  { %754 = vmatmul.bf16.gmra.mxu2 %v622_v17  ;;  %v771_v60 = vadd.f32 %v1430_v56, %v770_v51 }
 0x1ec   :  { %v555_v18 = vpop.f32.mrf.mxu1 }
 0x1ed   :  { %v556_v22 = vadd.f32 %v1393_v6, %v555_v18 }
 0x1ee   :  { %v715_v19 = vpop.f32.mrf.mxu2 }
 0x1ef   :  { %v1113_v20 = vpop.eup %1112  ;;  %v716_v21 = vadd.f32 %v1430_v56, %v715_v19  ;;  %v602_v27 = vmax.f32 %v556_v22, 0.0 }
 0x1f0   :  { %820 = vst [vmem:[#allocation10 + $0x18] sm:$0xff] %v1113_v20 }
 0x1f1   :  { %1114 = vtanh.f32 %v716_v21 }
 0x1f2   :  { %v772_v30 = vpop.f32.mrf.mxu3 }
 0x1f3   :  { %v773_v61 = vadd.f32 %v1430_v56, %v772_v30 }
 0x1f4   :  { %v557_v23 = vpop.f32.mrf.mxu1 }
 0x1f5   :  { %v558_v24 = vadd.f32 %v1393_v6, %v557_v23 }
 0x1f6   :  { %v717_v25 = vpop.f32.mrf.mxu2 }
 0x1f7   :  { %v1115_v26 = vpop.eup %1114  ;;  %v603_v28 = vmax.f32 %v558_v24, 0.0  ;;  %v718_v29 = vadd.f32 %v1430_v56, %v717_v25 }
 0x1f8   :  { %821 = vst [vmem:[#allocation10 + $0x20] sm:$0xff] %v1115_v26 }
 0x1f9   :  { %1116 = vtanh.f32 %v718_v29  ;;  %v623_v31 = vpack.c.bf16 %v603_v28, %v602_v27 }
 0x1fa   :  { %v775_v63 = vpop.f32.mrf.mxu3 }
 0x1fb   :  { %759 = vmatmul.bf16.gmra.mxu2 %v623_v31  ;;  %v776_v9 = vadd.f32 %v1430_v56, %v775_v63 }
 0x1fe   :  { %v720_v32 = vpop.f32.mrf.mxu2 }
 0x1ff   :  { %v1117_v33 = vpop.eup %1116  ;;  %v721_v34 = vadd.f32 %v1430_v56, %v720_v32 }
 0x200   :  { %822 = vst [vmem:[#allocation10 + $0x28] sm:$0xff] %v1117_v33 }
 0x201   :  { %1118 = vtanh.f32 %v721_v34 }
 0x202   :  { %v777_v5 = vpop.f32.mrf.mxu3 }
 0x203   :  { %v778_v10 = vadd.f32 %v1430_v56, %v777_v5 }
 0x206   :  { %v722_v35 = vpop.f32.mrf.mxu2 }
 0x207   :  { %v1119_v36 = vpop.eup %1118  ;;  %v723_v6 = vadd.f32 %v1430_v56, %v722_v35 }
 0x208   :  { %823 = vst [vmem:[#allocation10 + $0x30] sm:$0xff] %v1119_v36 }
 0x209   :  { %1120 = vtanh.f32 %v723_v6 }
 0x20a   :  { %v780_v12 = vpop.f32.mrf.mxu3 }
 0x20b   :  { %v781_v21 = vadd.f32 %v1430_v56, %v780_v12 }
 0x20e   :  { %v725_v37 = vpop.f32.mrf.mxu2 }
 0x20f   :  { %v1121_v38 = vpop.eup %1120  ;;  %v726_v39 = vadd.f32 %v1430_v56, %v725_v37 }
 0x210   :  { %824 = vst [vmem:[#allocation10 + $0x38] sm:$0xff] %v1121_v38 }
 0x211   :  { %1122 = vtanh.f32 %v726_v39 }
 0x212   :  { %v782_v18 = vpop.f32.mrf.mxu3 }
 0x213   :  { %v783_v22 = vadd.f32 %v1430_v56, %v782_v18 }
 0x216   :  { %v727_v40 = vpop.f32.mrf.mxu2 }
 0x217   :  { %v1123_v42 = vpop.eup %1122  ;;  %v728_v43 = vadd.f32 %v1430_v56, %v727_v40 }
 0x218   :  { %825 = vst [vmem:[#allocation10 + $0x40] sm:$0xff] %v1123_v42 }
 0x219   :  { %1124 = vtanh.f32 %v728_v43 }
 0x21e   :  { %v730_v44 = vpop.f32.mrf.mxu2 }
 0x21f   :  { %v1125_v46 = vpop.eup %1124  ;;  %v731_v47 = vadd.f32 %v1430_v56, %v730_v44 }
 0x220   :  { %826 = vst [vmem:[#allocation10 + $0x48] sm:$0xff] %v1125_v46 }
 0x221   :  { %1126 = vtanh.f32 %v731_v47 }
 0x222   :  { %1128 = vtanh.f32 %v766_v48 }
 0x223   :  { %1130 = vtanh.f32 %v768_v49 }
 0x226   :  { %v732_v50 = vpop.f32.mrf.mxu2 }
 0x227   :  { %v1127_v52 = vpop.eup %1126  ;;  %v733_v53 = vadd.f32 %v1430_v56, %v732_v50 }
 0x228   :  { %v1129_v54 = vpop.eup %1128  ;;  %827 = vst [vmem:[#allocation10 + $0x50] sm:$0xff] %v1127_v52 }
 0x229   :  { %v1131_v55 = vpop.eup %1130  ;;  %1132 = vtanh.f32 %v733_v53  ;;  %841 = vst [vmem:[#allocation10 + $0xc0] sm:$0xff] %v1129_v54 }
 0x22a   :  { %842 = vst [vmem:[#allocation10 + $0xc8] sm:$0xff] %v1131_v55 }
 0x22e   :  { %v735_v57 = vpop.f32.mrf.mxu2 }
 0x22f   :  { %v1133_v58 = vpop.eup %1132  ;;  %v736_v59 = vadd.f32 %v1430_v56, %v735_v57 }
 0x230   :  { %828 = vst [vmem:[#allocation10 + $0x58] sm:$0xff] %v1133_v58 }
 0x231   :  { %1134 = vtanh.f32 %v736_v59 }
 0x232   :  { %1136 = vtanh.f32 %v771_v60 }
 0x233   :  { %1138 = vtanh.f32 %v773_v61 }
 0x236   :  { %v737_v62 = vpop.f32.mrf.mxu2 }
 0x237   :  { %v1135_v0 = vpop.eup %1134  ;;  %v738_v1 = vadd.f32 %v1430_v56, %v737_v62 }
 0x238   :  { %v1137_v2 = vpop.eup %1136  ;;  %829 = vst [vmem:[#allocation10 + $0x60] sm:$0xff] %v1135_v0 }
 0x239   :  { %v1139_v3 = vpop.eup %1138  ;;  %1140 = vtanh.f32 %v738_v1  ;;  %843 = vst [vmem:[#allocation10 + $0xd0] sm:$0xff] %v1137_v2 }
 0x23a   :  { %844 = vst [vmem:[#allocation10 + $0xd8] sm:$0xff] %v1139_v3 }
 0x23e   :  { %v740_v4 = vpop.f32.mrf.mxu2 }
 0x23f   :  { %v1141_v7 = vpop.eup %1140  ;;  %v741_v8 = vadd.f32 %v1430_v56, %v740_v4 }
 0x240   :  { %830 = vst [vmem:[#allocation10 + $0x68] sm:$0xff] %v1141_v7 }
 0x241   :  { %1142 = vtanh.f32 %v741_v8 }
 0x242   :  { %1144 = vtanh.f32 %v776_v9 }
 0x243   :  { %1146 = vtanh.f32 %v778_v10 }
 0x246   :  { %v742_v11 = vpop.f32.mrf.mxu2 }
 0x247   :  { %v1143_v13 = vpop.eup %1142  ;;  %v743_v14 = vadd.f32 %v1430_v56, %v742_v11 }
 0x248   :  { %v1145_v15 = vpop.eup %1144  ;;  %831 = vst [vmem:[#allocation10 + $0x70] sm:$0xff] %v1143_v13 }
 0x249   :  { %v1147_v16 = vpop.eup %1146  ;;  %1148 = vtanh.f32 %v743_v14  ;;  %845 = vst [vmem:[#allocation10 + $0xe0] sm:$0xff] %v1145_v15 }
 0x24a   :  { %846 = vst [vmem:[#allocation10 + $0xe8] sm:$0xff] %v1147_v16 }
 0x24e   :  { %v745_v17 = vpop.f32.mrf.mxu2 }
 0x24f   :  { %v1149_v19 = vpop.eup %1148  ;;  %v746_v20 = vadd.f32 %v1430_v56, %v745_v17 }
 0x250   :  { %832 = vst [vmem:[#allocation10 + $0x78] sm:$0xff] %v1149_v19 }
 0x251   :  { %1150 = vtanh.f32 %v746_v20 }
 0x252   :  { %1152 = vtanh.f32 %v781_v21 }
 0x253   :  { %1154 = vtanh.f32 %v783_v22 }
 0x256   :  { %v747_v23 = vpop.f32.mrf.mxu2 }
 0x257   :  { %v1151_v24 = vpop.eup %1150  ;;  %v748_v25 = vadd.f32 %v1430_v56, %v747_v23 }
 0x258   :  { %v1153_v26 = vpop.eup %1152  ;;  %833 = vst [vmem:[#allocation10 + $0x80] sm:$0xff] %v1151_v24 }
 0x259   :  { %v1155_v27 = vpop.eup %1154  ;;  %1156 = vtanh.f32 %v748_v25  ;;  %847 = vst [vmem:[#allocation10 + $0xf0] sm:$0xff] %v1153_v26 }
 0x25a   :  { %848 = vst [vmem:[#allocation10 + $0xf8] sm:$0xff] %v1155_v27 }
 0x25e   :  { %v750_v28 = vpop.f32.mrf.mxu2 }
 0x25f   :  { %v1157_v29 = vpop.eup %1156  ;;  %v751_v31 = vadd.f32 %v1430_v56, %v750_v28 }
 0x260   :  { %834 = vst [vmem:[#allocation10 + $0x88] sm:$0xff] %v1157_v29 }
 0x261   :  { %1158 = vtanh.f32 %v751_v31 }
 0x266   :  { %v752_v32 = vpop.f32.mrf.mxu2 }
 0x267   :  { %v1159_v33 = vpop.eup %1158  ;;  %v753_v34 = vadd.f32 %v1430_v56, %v752_v32 }
 0x268   :  { %835 = vst [vmem:[#allocation10 + $0x90] sm:$0xff] %v1159_v33 }
 0x269   :  { %1160 = vtanh.f32 %v753_v34 }
 0x26e   :  { %v755_v35 = vpop.f32.mrf.mxu2 }
 0x26f   :  { %v1161_v36 = vpop.eup %1160  ;;  %v756_v6 = vadd.f32 %v1430_v56, %v755_v35 }
 0x270   :  { %836 = vst [vmem:[#allocation10 + $0x98] sm:$0xff] %v1161_v36 }
 0x271   :  { %1162 = vtanh.f32 %v756_v6 }
 0x276   :  { %v757_v37 = vpop.f32.mrf.mxu2 }
 0x277   :  { %v1163_v38 = vpop.eup %1162  ;;  %v758_v39 = vadd.f32 %v1430_v56, %v757_v37 }
 0x278   :  { %837 = vst [vmem:[#allocation10 + $0xa0] sm:$0xff] %v1163_v38 }
 0x279   :  { %1164 = vtanh.f32 %v758_v39 }
 0x27e   :  { %v760_v40 = vpop.f32.mrf.mxu2 }
 0x27f   :  { %v1165_v41 = vpop.eup %1164  ;;  %v761_v42 = vadd.f32 %v1430_v56, %v760_v40 }
 0x280   :  { %838 = vst [vmem:[#allocation10 + $0xa8] sm:$0xff] %v1165_v41 }
 0x281   :  { %1166 = vtanh.f32 %v761_v42 }
 0x286   :  { %v762_v43 = vpop.f32.mrf.mxu2 }
 0x287   :  { %v1167_v44 = vpop.eup %1166  ;;  %v763_v45 = vadd.f32 %v1430_v56, %v762_v43 }
 0x288   :  { %839 = vst [vmem:[#allocation10 + $0xb0] sm:$0xff] %v1167_v44 }
 0x289   :  { %1168 = vtanh.f32 %v763_v45 }
 0x28f   :  { %v1169_v46 = vpop.eup %1168 }
 0x290   :  { %840 = vst [vmem:[#allocation10 + $0xb8] sm:$0xff] %v1169_v46 }
 0x291   :  { %861 = dma.vmem_to_hbm [thread:$0]  %s854_s23, 4096, %s856_s26, [#allocation4], %s1305_s27, %s1305_s27, %s1306_s28  }
 0x292   :  { %1296 = dma.done.wait [#allocation4], 4096  }
 0x293   :  { %1297 = vsyncadd [#allocation4], 4294963200 }
 0x294   :  { %866 = vsyncpa [#allocation3], 1 }
 0x295   :  { %867 = vsyncpa [#allocation6], 1 }
 0x296   :  { %868 = vsyncpa [#allocation9], 1 }
 0x297   :  { %869 = vsyncpa [#allocation4], 1 }

</bundles_post_ra>
